<compile_context>
chip_gen: v7x
topology: tpu7x:2x2x1
jax: 0.10.0
libtpu: 0.0.40
codegen_flags: <defaults>
</compile_context>

<pallas_src>
import functools

import jax
import jax.numpy as jnp
from jax import lax
from jax.experimental import pallas as pl
from jax.experimental.pallas import tpu as pltpu


# --------------------------------------------------------------------------- #
# Kernel 1: tiled linear (used for to_qkv)                                     #
# --------------------------------------------------------------------------- #
def _linear_kernel(x_ref, w_ref, o_ref):
    o_ref[...] = jnp.dot(x_ref[...], w_ref[...],
                         preferred_element_type=jnp.float32).astype(o_ref.dtype)


def _tiled_linear(x, w, *, tile_m=512):
    """y = x @ w, tiled over rows (M) with BlockSpec double-buffering."""
    M, cin = x.shape
    cout = w.shape[1]
    tm = min(tile_m, M)
    return pl.pallas_call(
        _linear_kernel,
        out_shape=jax.ShapeDtypeStruct((M, cout), jnp.float32),
        grid_spec=pltpu.PrefetchScalarGridSpec(
            num_scalar_prefetch=0,
            grid=(pl.cdiv(M, tm),),
            in_specs=[pl.BlockSpec((tm, cin), lambda i: (i, 0)),
                      pl.BlockSpec((cin, cout), lambda i: (0, 0))],
            out_specs=pl.BlockSpec((tm, cout), lambda i: (i, 0))),
        compiler_params=pltpu.CompilerParams(
            dimension_semantics=("parallel",),
            vmem_limit_bytes=32 * 1024 * 1024),
    )(x, w)


# --------------------------------------------------------------------------- #
# Kernel 2: pos_mlp, batched over all B*K*N relative positions                 #
# --------------------------------------------------------------------------- #
def _pos_mlp_kernel(rel_ref, w1_ref, b1_ref, w2_ref, b2_ref, emb_ref):
    h = jnp.maximum(
        jnp.dot(rel_ref[...], w1_ref[...], preferred_element_type=jnp.float32)
        + b1_ref[...], 0.0)
    emb_ref[...] = (jnp.dot(h, w2_ref[...], preferred_element_type=jnp.float32)
                    + b2_ref[...]).astype(emb_ref.dtype)


def _pos_mlp(rel_flat, w1, b1, w2, b2, *, tile_m=512):
    M = rel_flat.shape[0]
    h1 = w1.shape[1]
    c = w2.shape[1]
    tm = min(tile_m, M)
    return pl.pallas_call(
        _pos_mlp_kernel,
        out_shape=jax.ShapeDtypeStruct((M, c), jnp.float32),
        grid_spec=pltpu.PrefetchScalarGridSpec(
            num_scalar_prefetch=0,
            grid=(pl.cdiv(M, tm),),
            in_specs=[pl.BlockSpec((tm, 3), lambda i: (i, 0)),
                      pl.BlockSpec((3, h1), lambda i: (0, 0)),
                      pl.BlockSpec((1, h1), lambda i: (0, 0)),
                      pl.BlockSpec((h1, c), lambda i: (0, 0)),
                      pl.BlockSpec((1, c), lambda i: (0, 0))],
            out_specs=pl.BlockSpec((tm, c), lambda i: (i, 0))),
        compiler_params=pltpu.CompilerParams(
            dimension_semantics=("parallel",),
            vmem_limit_bytes=32 * 1024 * 1024),
    )(rel_flat, w1, b1, w2, b2)


# --------------------------------------------------------------------------- #
# Kernel 3: main attention kernel (in-kernel gather + batched attn_mlp +       #
#           single-pass softmax / weighted sum)                                #
# --------------------------------------------------------------------------- #
def _attn_kernel(idx_ref,                      # SMEM (B*K*N,) int32  (prefetch)
                 q_ref,                        # (TN, C)
                 k_ref, v_ref,                 # (N, C) each, full batch row
                 emb_ref,                      # (K, TN, C)
                 w3a_ref, w3b_ref, b3_ref, w4t_ref,
                 out_ref,                      # (TN, C)
                 k_scr, v_scr):                # VMEM (K*TN, C) each
    TN, C = q_ref.shape
    K = emb_ref.shape[0]
    N = k_ref.shape[0]
    b = pl.program_id(0)
    t = pl.program_id(1)

    # ---- in-kernel neighbour gather --------------------------------------- #
    # idx is neighbour-major: flat offset = b*K*N + j*N + global_row.
    # Scratch row r = j*TN + i holds neighbour j of query row (t*TN + i).
    # TODO(synk): the per-row copy loop is the remaining serial part; a
    # vectorised VMEM gather could replace it once robustly supported.
    def gather_j(j, carry):
        src_base = b * (K * N) + j * N + t * TN
        dst_base = j * TN

        def gather_i(i, c):
            nid = idx_ref[src_base + i]
            row = dst_base + i
            k_scr[pl.ds(row, 1), :] = k_ref[pl.ds(nid, 1), :]
            v_scr[pl.ds(row, 1), :] = v_ref[pl.ds(nid, 1), :]
            return c

        return lax.fori_loop(0, TN, gather_i, carry, unroll=8)

    lax.fori_loop(0, K, gather_j, 0)

    # ---- batched attn_mlp over all K*TN rows ------------------------------ #
    q = q_ref[...]                                         # (TN, C)
    q_rep = jnp.concatenate([q] * K, axis=0)               # (K*TN, C)
    emb = jnp.concatenate([emb_ref[j] for j in range(K)], axis=0)  # (K*TN, C)
    kg = k_scr[...]                                        # (K*TN, C)
    vg = v_scr[...]                                        # (K*TN, C)

    qk_rel = q_rep - kg
    vv = vg + emb

    # attn_mlp layer 1 on concat([qk_rel, emb]) == qk_rel @ W3a + emb @ W3b
    h = jnp.maximum(
        jnp.dot(qk_rel, w3a_ref[...], preferred_element_type=jnp.float32)
        + jnp.dot(emb, w3b_ref[...], preferred_element_type=jnp.float32)
        + b3_ref[...], 0.0)                                # (K*TN, H2)

    # attn_mlp layer 2 has output width 1: VPU multiply + lane reduce instead
    # of a degenerate (H2, 1) MXU matmul.  Its bias is the same for every
    # neighbour and cancels in the softmax, so it is dropped.
    sim = jnp.sum(h * w4t_ref[...], axis=-1, keepdims=True)  # (K*TN, 1)

    # ---- softmax over neighbours + weighted value sum (single pass) -------- #
    # Static sublane slices (TN is a multiple of 8); normalisation is factored
    # out: out = (sum_j e_j * v_j) / (sum_j e_j).  Only light VPU work per j.
    sims = [sim[j * TN:(j + 1) * TN, :] for j in range(K)]   # (TN, 1) each
    m = functools.reduce(jnp.maximum, sims)                  # (TN, 1)
    exps = [jnp.exp(s - m) for s in sims]
    denom = functools.reduce(jnp.add, exps)                  # (TN, 1)
    acc = jnp.zeros((TN, C), jnp.float32)
    for j in range(K):
        acc = acc + exps[j] * vv[j * TN:(j + 1) * TN, :]
    out_ref[...] = (acc / denom).astype(out_ref.dtype)


# --------------------------------------------------------------------------- #
# Wrapper                                                                      #
# --------------------------------------------------------------------------- #
def point_transformer_layer(x, pos, params, num_neighbors, *, n_tile=128):
    B, N, C = x.shape
    K = num_neighbors
    H1 = params['w1'].shape[1]
    H2 = params['w3a'].shape[1]

    # ---- to_qkv: tiled Pallas matmul over M = B*N rows --------------------- #
    qkv = _tiled_linear(x.reshape(B * N, C), params['w_qkv'])
    q, k, v = jnp.split(qkv.reshape(B, N, 3 * C), 3, axis=-1)

    # ---- kNN selection (glue) ---------------------------------------------- #
    # TODO(synk): top-k neighbour selection has no clean Pallas TPU primitive;
    # it (and the tiny 3-wide relative-position gather) stays in plain JAX.
    diff = pos[:, :, None, :] - pos[:, None, :, :]
    dist2 = jnp.sum(diff * diff, axis=-1)        # squared distance: same top-k
    _, idx = lax.top_k(-dist2, K)                # (B, N, K), smallest-K
    idx = idx.astype(jnp.int32)

    bidx = jnp.arange(B)[:, None, None]
    rel = pos[:, :, None, :] - pos[bidx, idx]    # (B, N, K, 3) -- 3-wide, cheap

    # ---- pos_mlp: one batched kernel over M = B*K*N rows ------------------- #
    rel_t = jnp.transpose(rel, (0, 2, 1, 3)).reshape(B * K * N, 3)
    emb = _pos_mlp(rel_t, params['w1'], params['b1'], params['w2'], params['b2'])
    emb = emb.reshape(B, K, N, C)                # neighbour-major, lane-dense C

    # neighbour indices, neighbour-major and flattened for SMEM scalar prefetch
    idx_flat = jnp.transpose(idx, (0, 2, 1)).reshape(B * K * N)

    # ---- main kernel: grid over (batch, N tiles) ---------------------------- #
    TN = N
    for cand in (256, 128, 64, 32, 16, 8):
        if cand <= n_tile and N % cand == 0:
            TN = cand
            break
    w4t = params['w4'].reshape(1, H2)            # (H2, 1) -> (1, H2) row

    grid_spec = pltpu.PrefetchScalarGridSpec(
        num_scalar_prefetch=1,
        grid=(B, N // TN),
        in_specs=[
            pl.BlockSpec((None, TN, C), lambda b, t, _: (b, t, 0)),       # q tile
            pl.BlockSpec((None, N, C), lambda b, t, _: (b, 0, 0)),        # k row
            pl.BlockSpec((None, N, C), lambda b, t, _: (b, 0, 0)),        # v row
            pl.BlockSpec((None, K, TN, C), lambda b, t, _: (b, 0, t, 0)),  # emb
            pl.BlockSpec((C, H2), lambda b, t, _: (0, 0)),                # W3a
            pl.BlockSpec((C, H2), lambda b, t, _: (0, 0)),                # W3b
            pl.BlockSpec((1, H2), lambda b, t, _: (0, 0)),                # b3
            pl.BlockSpec((1, H2), lambda b, t, _: (0, 0)),                # w4 row
        ],
        out_specs=pl.BlockSpec((None, TN, C), lambda b, t, _: (b, t, 0)),
        scratch_shapes=[pltpu.VMEM((K * TN, C), jnp.float32),
                        pltpu.VMEM((K * TN, C), jnp.float32)],
    )

    out = pl.pallas_call(
        _attn_kernel,
        out_shape=jax.ShapeDtypeStruct((B, N, C), jnp.float32),
        grid_spec=grid_spec,
        compiler_params=pltpu.CompilerParams(
            dimension_semantics=("parallel", "parallel"),
            vmem_limit_bytes=32 * 1024 * 1024),
    )(idx_flat, q, k, v, emb,
      params['w3a'], params['w3b'], params['b3'], w4t)
    return out


# --------------------------------------------------------------------------- #
# Pure-JAX reference                                                           #
# --------------------------------------------------------------------------- #
def reference(x, pos, params, K):
    B = x.shape[0]
    qkv = x @ params['w_qkv']
    q, k, v = jnp.split(qkv, 3, axis=-1)
    diff = pos[:, :, None, :] - pos[:, None, :, :]
    dist2 = jnp.sum(diff * diff, axis=-1)
    _, idx = jax.lax.top_k(-dist2, K)
    bidx = jnp.arange(B)[:, None, None]
    rel = pos[:, :, None, :] - pos[bidx, idx]
    emb = (jnp.maximum(rel @ params['w1'] + params['b1'], 0.0)
           @ params['w2'] + params['b2'])
    kg = k[bidx, idx]
    vg = v[bidx, idx]
    qk_rel = q[:, :, None, :] - kg
    vv = vg + emb
    h = jnp.maximum(qk_rel @ params['w3a'] + emb @ params['w3b'] + params['b3'], 0.0)
    sim = h @ params['w4'] + params['b4']
    attn = jax.nn.softmax(sim, axis=-2)
    return jnp.sum(attn * vv, axis=-2)


# --------------------------------------------------------------------------- #
# Main                                                                         #
# --------------------------------------------------------------------------- #
if __name__ == "__main__":
    B, N, C, K = 2, 16, 8, 4          # batch, points, dim, num_neighbors (K < N)
    H1, H2 = 16, 4 * C                # pos_mlp hidden, attn_mlp hidden (mult=4)

    key = jax.random.PRNGKey(0)
    ks = jax.random.split(key, 12)
    params = dict(
        w_qkv=0.1 * jax.random.normal(ks[0], (C, 3 * C), jnp.float32),
        w1=0.1 * jax.random.normal(ks[1], (3, H1), jnp.float32),
        b1=0.1 * jax.random.normal(ks[2], (1, H1), jnp.float32),
        w2=0.1 * jax.random.normal(ks[3], (H1, C), jnp.float32),
        b2=0.1 * jax.random.normal(ks[4], (1, C), jnp.float32),
        w3a=0.1 * jax.random.normal(ks[5], (C, H2), jnp.float32),
        w3b=0.1 * jax.random.normal(ks[6], (C, H2), jnp.float32),
        b3=0.1 * jax.random.normal(ks[7], (1, H2), jnp.float32),
        w4=0.1 * jax.random.normal(ks[8], (H2, 1), jnp.float32),
        b4=0.1 * jax.random.normal(ks[9], (1, 1), jnp.float32),
    )
    x = jax.random.normal(ks[10], (B, N, C), jnp.float32)
    pos = jax.random.normal(ks[11], (B, N, 3), jnp.float32)

    out = point_transformer_layer(x, pos, params, num_neighbors=K)
    out = jax.block_until_ready(out)

    ref = reference(x, pos, params, K)
    assert out.shape == (B, N, C)
    assert jnp.allclose(out, ref, atol=1e-4, rtol=1e-4), "kernel/reference mismatch"
    print("KERNEL_OK")
</pallas_src>

<mosaic_0001>
module attributes {stable_mosaic.version = 11 : i64} {
  func.func @_linear_kernel(%arg0: i32, %arg1: memref<32x8xf32, #tpu.memory_space<vmem>>, %arg2: memref<8x24xf32, #tpu.memory_space<vmem>>, %arg3: memref<32x24xf32, #tpu.memory_space<vmem>>) attributes {dimension_semantics = [#tpu.dimension_semantics<parallel>], iteration_bounds = array<i64: 1>, scalar_prefetch = 0 : i64, scratch_operands = 0 : i64, tpu.core_type = #tpu.core_type<tc>, window_params = [{transform_indices = @transform_0, window_bounds = array<i64: 32, 8>}, {pipeline_mode = #tpu.pipeline_mode<synchronous>, transform_indices = @transform_1, window_bounds = array<i64: 8, 24>}, {transform_indices = @transform_2, window_bounds = array<i64: 32, 24>}]} {
    %c0 = arith.constant 0 : index
    %c0_0 = arith.constant 0 : index
    %0 = vector.load %arg1[%c0, %c0_0] : memref<32x8xf32, #tpu.memory_space<vmem>>, vector<32x8xf32>
    %c0_1 = arith.constant 0 : index
    %c0_2 = arith.constant 0 : index
    %1 = vector.load %arg2[%c0_1, %c0_2] : memref<8x24xf32, #tpu.memory_space<vmem>>, vector<8x24xf32>
    %cst = arith.constant dense<0.000000e+00> : vector<32x24xf32>
    %2 = tpu.matmul %0, %1, %cst {dimension_numbers = #tpu.dot_dimension_numbers<[1], [0], [0], [1], [0, 0, 1, 1], [], []>} : vector<32x8xf32>, vector<8x24xf32>, vector<32x24xf32> -> vector<32x24xf32>
    %c0_3 = arith.constant 0 : index
    %c0_4 = arith.constant 0 : index
    %3 = vector.load %arg3[%c0_3, %c0_4] : memref<32x24xf32, #tpu.memory_space<vmem>>, vector<32x24xf32>
    tpu.vector_store %arg3[%c0_3, %c0_4], %2 {strides = array<i32>} : memref<32x24xf32, #tpu.memory_space<vmem>>, vector<32x24xf32>,
    return
  }
  func.func @transform_0(%arg0: i32) -> (i32, i32) {
    %c0_i32 = arith.constant 0 : i32
    %c0_i32_0 = arith.constant 0 : i32
    return %arg0, %c0_i32 : i32, i32
  }
  func.func @transform_1(%arg0: i32) -> (i32, i32) {
    %c0_i32 = arith.constant 0 : i32
    %c0_i32_0 = arith.constant 0 : i32
    %c0_i32_1 = arith.constant 0 : i32
    return %c0_i32, %c0_i32_0 : i32, i32
  }
  func.func @transform_2(%arg0: i32) -> (i32, i32) {
    %c0_i32 = arith.constant 0 : i32
    %c0_i32_0 = arith.constant 0 : i32
    return %arg0, %c0_i32 : i32, i32
  }
}

</mosaic_0001>

<bundles_post_ra>
// kernel: tpu_custom_call.1
= control target key start
LH: loop header
LB: loop body
LE: loop exit
PB: predicated region body
PF: predicated region fallthrough
CT: control target
= control target key end

     0   :  { %vm16_vm0 = vcmask 64512   ;;  %vm114_vm1 = vcmask 195584   ;;  %s184_s1 = inlined_call_operand.vmem [shape: f32[8,24], index: 1, kind: input, shape index: {}]   ;;  %s185_s0 = inlined_call_operand.vmem [shape: f32[32,8], index: 0, kind: input, shape index: {}]   ;;  %s186_s2 = inlined_call_operand.vmem [shape: f32[32,24], index: 2, kind: output, shape index: {}]  }
   0x1   :  { %v15_v0 = vld [vmem:[%s184_s1] sm:$0xff]  ;;  %v13_v2 = vld [vmem:[%s185_s0 + $0x10] sm:$0xff]  ;;  %v12_v3 = vld [vmem:[%s185_s0 + $0x8] sm:$0xff] }
   0x2   :  { %v11_v1 = vld [vmem:[%s185_s0] sm:$0xff]  ;;  %132 = vmatprep.subr.mxu0 %v15_v0  ;;  %140 = vmatprep.subr.mxu1 %v15_v0  ;;  %v14_v4 = vld [vmem:[%s185_s0 + $0x18] sm:$0xff] }
   0x3   :  { %133 = vmatpush3.msra.mxu0 %v15_v0  ;;  %141 = vmatpush3.msra.mxu1 %v15_v0 }
   0x4   :  { %134 = vmatprep.mubr.msk.f32.mxu0 %vm16_vm0, %v11_v1  ;;  %137 = vmatprep.mubr.msk.f32.mxu1 %vm16_vm0, %v13_v2 }
   0x5   :  { %135 = vmatmul.mubr.msk.f32.vlgmr.msra.gmra.mrb[0].mxu0 %vm16_vm0, %v12_v3  ;;  %138 = vmatmul.mubr.msk.f32.vlgmr.msra.gmra.mrb[0].mxu1 %vm16_vm0, %v14_v4 }
  0xd8   :  { %v136_v5 = vpop.f32.mrb[0].mxu0  ;;  %v139_v6 = vpop.f32.mrb[0].mxu1 }
  0xd9   :  { %116 = vst.msk [vmem:[%s186_s2 + $0x8] sm:$0xff] %vm114_vm1, %v136_v5  ;;  %118 = vst.msk [vmem:[%s186_s2 + $0x18] sm:$0xff] %vm114_vm1, %v139_v6  ;;  %v95_v7 = vpop.f32.mrb[1].mxu0  ;;  %v105_v8 = vpop.f32.mrb[1].mxu1 }
  0xda   :  { %115 = vst.msk [vmem:[%s186_s2] sm:$0xff] %vm114_vm1, %v95_v7  ;;  %117 = vst.msk [vmem:[%s186_s2 + $0x10] sm:$0xff] %vm114_vm1, %v105_v8 }

</bundles_post_ra>
